<compile_context>
chip_gen: v7x
topology: tpu7x:2x2x1
jax: 0.10.0
libtpu: 0.0.40
codegen_flags: <defaults>
</compile_context>

<pallas_src>
import functools

import jax
import jax.numpy as jnp
from jax.experimental import pallas as pl
from jax.experimental.pallas import tpu as pltpu


def _linear_lane_dense_kernel(w_ref, b_ref, xT_ref, o_ref):
    """o[n, :] = sum_k w[n*K + k] * xT[k, :] + b[n]   (all on the VPU).

    w_ref : SMEM (N*K,)  row-major flattened weight (PyTorch layout)
    b_ref : SMEM (N,)
    xT_ref: VMEM (K, TB) -- batch on the lane axis
    o_ref : VMEM (N, TB) -- batch on the lane axis (lane-dense stores)
    """
    K = xT_ref.shape[0]
    N = o_ref.shape[0]
    for n in range(N):                            # N == 1 for this module
        acc = xT_ref[0:1, :].astype(jnp.float32) * w_ref[n * K + 0]
        for k in range(1, K):                     # K == 4, fully unrolled FMAs
            acc = acc + xT_ref[k:k + 1, :].astype(jnp.float32) * w_ref[n * K + k]
        o_ref[n:n + 1, :] = (acc + b_ref[n]).astype(o_ref.dtype)


@functools.partial(jax.jit, static_argnames=("tile_b",))
def mlp_forward(x, weight, bias, *, tile_b=2048):
    """x: (B, K); weight: (N, K) (PyTorch layout); bias: (N,). Returns (B, N)."""
    B, K = x.shape
    N = weight.shape[0]

    # Layout plumbing: put batch on the lane (last) axis for the kernel.
    xT = x.T                                      # (K, B)

    # Batch tile: full array if it fits in one tile, else a multiple of 128.
    if B <= tile_b:
        tb = B
    else:
        tb = max(128, (tile_b // 128) * 128)
    pad = (-B) % tb
    if pad:
        xT = jnp.pad(xT, ((0, 0), (0, pad)))
    Bp = B + pad
    grid = (Bp // tb,)

    itemsize = jnp.dtype(x.dtype).itemsize
    cost = pl.CostEstimate(
        flops=2 * B * K * N,
        transcendentals=0,
        bytes_accessed=(B * K + N * K + N + B * N) * itemsize,
    )

    yT = pl.pallas_call(
        _linear_lane_dense_kernel,
        out_shape=jax.ShapeDtypeStruct((N, Bp), x.dtype),
        grid=grid,
        in_specs=[
            # 5 scalars: keep them whole in SMEM (no per-step VMEM DMA).
            pl.BlockSpec(memory_space=pltpu.MemorySpace.SMEM),  # flat weight (N*K,)
            pl.BlockSpec(memory_space=pltpu.MemorySpace.SMEM),  # bias (N,)
            # x^T streamed in lane-dense batch tiles.
            pl.BlockSpec((K, tb), lambda i: (0, i)),
        ],
        out_specs=pl.BlockSpec((N, tb), lambda i: (0, i)),
        compiler_params=pltpu.CompilerParams(
            dimension_semantics=("parallel",),
        ),
        cost_estimate=cost,
    )(weight.reshape(-1), bias, xT)

    # Back to PyTorch convention (B, N); free re-layout for N == 1.
    return yT[:, :B].T


if __name__ == "__main__":
    key = jax.random.PRNGKey(0)
    k_x, k_w, k_b = jax.random.split(key, 3)

    B, IN, OUT = 8, 4, 1
    # Deterministic parameter init mimicking nn.Linear: U(-1/sqrt(in), 1/sqrt(in))
    bound = 1.0 / jnp.sqrt(jnp.float32(IN))
    weight = jax.random.uniform(k_w, (OUT, IN), jnp.float32, -bound, bound)
    bias = jax.random.uniform(k_b, (OUT,), jnp.float32, -bound, bound)

    x = jax.random.normal(k_x, (B, IN), jnp.float32)

    y = mlp_forward(x, weight, bias)
    jax.block_until_ready(y)

    y_ref = x @ weight.T + bias
    assert y.shape == (B, OUT)
    assert jnp.allclose(y, y_ref, atol=1e-5), "mismatch vs reference (B=8)"

    # Exercise the tiled / padded grid path once (two 128-wide batch tiles).
    B2 = 200
    x2 = jax.random.normal(jax.random.PRNGKey(1), (B2, IN), jnp.float32)
    y2 = mlp_forward(x2, weight, bias, tile_b=128)
    jax.block_until_ready(y2)
    y2_ref = x2 @ weight.T + bias
    assert y2.shape == (B2, OUT)
    assert jnp.allclose(y2, y2_ref, atol=1e-5), "mismatch vs reference (B=200)"

    print("KERNEL_OK")
</pallas_src>

<mosaic_0001>
module attributes {stable_mosaic.version = 11 : i64} {
  func.func @_linear_lane_dense_kernel(%arg0: i32, %arg1: memref<4xf32, #tpu.memory_space<smem>>, %arg2: memref<1xf32, #tpu.memory_space<smem>>, %arg3: memref<4x8xf32, #tpu.memory_space<vmem>>, %arg4: memref<1x8xf32, #tpu.memory_space<vmem>>) attributes {dimension_semantics = [#tpu.dimension_semantics<parallel>], iteration_bounds = array<i64: 1>, scalar_prefetch = 0 : i64, scratch_operands = 0 : i64, tpu.core_type = #tpu.core_type<tc>, window_params = [{transform_indices = @transform_0, window_bounds = array<i64: 4>}, {transform_indices = @transform_1, window_bounds = array<i64: 1>}, {transform_indices = @transform_2, window_bounds = array<i64: 4, 8>}, {transform_indices = @transform_3, window_bounds = array<i64: 1, 8>}]} {
    %c0 = arith.constant 0 : index
    %c0_0 = arith.constant 0 : index
    %0 = vector.load %arg3[%c0, %c0_0] : memref<4x8xf32, #tpu.memory_space<vmem>>, vector<1x8xf32>
    %c0_1 = arith.constant 0 : index
    %1 = memref.load %arg1[%c0_1] : memref<4xf32, #tpu.memory_space<smem>>
    %2 = vector.broadcast %1 : f32 to vector<1x8xf32>
    %3 = arith.mulf %0, %2 : vector<1x8xf32>
    %c1 = arith.constant 1 : index
    %c0_2 = arith.constant 0 : index
    %4 = vector.load %arg3[%c1, %c0_2] : memref<4x8xf32, #tpu.memory_space<vmem>>, vector<1x8xf32>
    %c1_3 = arith.constant 1 : index
    %5 = memref.load %arg1[%c1_3] : memref<4xf32, #tpu.memory_space<smem>>
    %6 = vector.broadcast %5 : f32 to vector<1x8xf32>
    %7 = arith.mulf %4, %6 : vector<1x8xf32>
    %8 = arith.addf %3, %7 : vector<1x8xf32>
    %c2 = arith.constant 2 : index
    %c0_4 = arith.constant 0 : index
    %9 = vector.load %arg3[%c2, %c0_4] : memref<4x8xf32, #tpu.memory_space<vmem>>, vector<1x8xf32>
    %c2_5 = arith.constant 2 : index
    %10 = memref.load %arg1[%c2_5] : memref<4xf32, #tpu.memory_space<smem>>
    %11 = vector.broadcast %10 : f32 to vector<1x8xf32>
    %12 = arith.mulf %9, %11 : vector<1x8xf32>
    %13 = arith.addf %8, %12 : vector<1x8xf32>
    %c3 = arith.constant 3 : index
    %c0_6 = arith.constant 0 : index
    %14 = vector.load %arg3[%c3, %c0_6] : memref<4x8xf32, #tpu.memory_space<vmem>>, vector<1x8xf32>
    %c3_7 = arith.constant 3 : index
    %15 = memref.load %arg1[%c3_7] : memref<4xf32, #tpu.memory_space<smem>>
    %16 = vector.broadcast %15 : f32 to vector<1x8xf32>
    %17 = arith.mulf %14, %16 : vector<1x8xf32>
    %18 = arith.addf %13, %17 : vector<1x8xf32>
    %c0_8 = arith.constant 0 : index
    %19 = memref.load %arg2[%c0_8] : memref<1xf32, #tpu.memory_space<smem>>
    %20 = vector.broadcast %19 : f32 to vector<1x8xf32>
    %21 = arith.addf %18, %20 : vector<1x8xf32>
    %c0_9 = arith.constant 0 : index
    %c0_10 = arith.constant 0 : index
    %22 = vector.load %arg4[%c0_9, %c0_10] : memref<1x8xf32, #tpu.memory_space<vmem>>, vector<1x8xf32>
    tpu.vector_store %arg4[%c0_9, %c0_10], %21 {strides = array<i32>} : memref<1x8xf32, #tpu.memory_space<vmem>>, vector<1x8xf32>,
    return
  }
  func.func @transform_0(%arg0: i32) -> i32 {
    %c0_i32 = arith.constant 0 : i32
    %c0_i32_0 = arith.constant 0 : i32
    return %c0_i32 : i32
  }
  func.func @transform_1(%arg0: i32) -> i32 {
    %c0_i32 = arith.constant 0 : i32
    %c0_i32_0 = arith.constant 0 : i32
    return %c0_i32 : i32
  }
  func.func @transform_2(%arg0: i32) -> (i32, i32) {
    %c0_i32 = arith.constant 0 : i32
    %c0_i32_0 = arith.constant 0 : i32
    return %c0_i32, %arg0 : i32, i32
  }
  func.func @transform_3(%arg0: i32) -> (i32, i32) {
    %c0_i32 = arith.constant 0 : i32
    %c0_i32_0 = arith.constant 0 : i32
    return %c0_i32, %arg0 : i32, i32
  }
}

</mosaic_0001>

<bundles_post_ra>
// kernel: mlp_forward.1
= control target key start
LH: loop header
LB: loop body
LE: loop exit
PB: predicated region body
PF: predicated region fallthrough
CT: control target
= control target key end

     0   :  { %9 = vsyncpa [#allocation5], 0  ;;  %s163_s0 = inlined_call_operand.vmem [shape: f32[4], index: 0, kind: input, shape index: {}]   ;;  %s164_s1 = inlined_call_operand.<no memory space> [shape: f32[1], index: 1, kind: input, shape index: {}]   ;;  %s165_s2 = inlined_call_operand.vmem [shape: f32[4,8], index: 2, kind: input, shape index: {}]   ;;  %s166_s3 = inlined_call_operand.hbm [shape: f32[1,8], index: 3, kind: output, shape index: {}]  }
   0x1   :  { %10 = vsyncpa [#allocation4], 0  ;;  %s17_s14 = sshll.u32 %s163_s0, 4  ;;  %s18_s14 = int_to_ptr.vmem [resolvable:$true] %s17_s14 }
   0x2   :  { %s73_s15 = scalar_lea.vmem %s18_s14, 16  ;;  %p78_p1 = scmp.lt.s32.totalorder %s18_s14, %s18_s14 }
   0x3   :  { %p74_p0 = scmp.ne.s32.totalorder %s18_s14, %s73_s15  ;;  %p79_p2 = scmp.lt.s32.totalorder %s73_s15, %s73_s15 }
   0x5   :  { %p80_p3 = por %p79_p2, %p78_p1 }
   0x7   :  { %p81_p4 = pnand %p80_p3, %p74_p0 }
   0x9   :  { %84 = shalt.err (!%p81_p4)
}
   0xa   :  { %s111_s16 = smov [#allocation3]  }
   0xb   :  { %20 = dma.vmem_to_smem %s18_s14, 16, %s111_s16, [#allocation5]  }
   0xc   :  { %107 = dma.done.wait [#allocation5], 16  }
   0xd   :  { %108 = vsyncadd [#allocation5], 4294967280 }
   0xe   :  { %28 = sfence }
   0xf   :  { %s30_s17 = sld [smem:[#allocation3]]  ;;  %s68_s18 = sld [smem:[#allocation3 + $0x1]]  ;;  %v29_v0 = vld [vmem:[%s165_s2] sm:$0x1]  ;;  %v33_v1 = vld [vmem:[%s165_s2 + $0x1] sm:$0x1]  ;;  %v49_v14 = vstv %s164_s1 }
  0x10   :  { %s69_s19 = sld [smem:[#allocation3 + $0x2]]  ;;  %s70_s20 = sld [smem:[#allocation3 + $0x3]]  ;;  %v38_v2 = vld [vmem:[%s165_s2 + $0x2] sm:$0x1]  ;;  %v43_v7 = vld [vmem:[%s165_s2 + $0x3] sm:$0x1] }
  0x11   :  { %s112_s30 = smov [#allocation6]   ;;  %vm51_vm0 = vcmask 57344  }
  0x12   :  { %s59_s4 = sshll.u32 %s112_s30, 4  ;;  %s60_s4 = int_to_ptr.vmem [resolvable:$true] %s59_s4 }
  0x13   :  { %s85_s5 = scalar_lea.vmem %s60_s4, 16  ;;  %s89_s2 = scalar_lea.vmem %s60_s4, 32 }
  0x14   :  { %p86_p5 = scmp.ne.s32.totalorder %s60_s4, %s85_s5  ;;  %p90_p6 = scmp.lt.s32.totalorder %s60_s4, %s60_s4 }
  0x15   :  { %v31_v3 = vstv %s30_s17  ;;  %v35_v5 = vstv %s68_s18  ;;  %p91_p7 = scmp.lt.s32.totalorder %s89_s2, %s85_s5 }
  0x16   :  { %v32_v4 = vmul.f32 %v31_v3, %v29_v0  ;;  %v40_v6 = vstv %s69_s19  ;;  %v36_v8 = vmul.f32 %v35_v5, %v33_v1  ;;  %v45_v10 = vstv %s70_s20 }
  0x17   :  { %v41_v9 = vmul.f32 %v40_v6, %v38_v2  ;;  %v46_v12 = vmul.f32 %v45_v10, %v43_v7  ;;  %p92_p8 = por %p91_p7, %p90_p6 }
  0x18   :  { %v37_v11 = vadd.f32 %v36_v8, %v32_v4 }
  0x19   :  { %p93_p9 = pnand %p92_p8, %p86_p5 }
  0x1a   :  { %v42_v13 = vadd.f32 %v41_v9, %v37_v11 }
  0x1c   :  { %v47_v15 = vadd.f32 %v46_v12, %v42_v13 }
  0x1e   :  { %v50_v16 = vadd.f32 %v49_v14, %v47_v15 }
  0x20   :  { %52 = vst.msk [vmem:[#allocation6] sm:$0x1] %vm51_vm0, %v50_v16 }
  0x21   :  { %96 = shalt.err (!%p93_p9)
}
  0x22   :  { %s97_s8 = scalar_lea.hbm %s166_s3, 16 }
  0x23   :  { %p98_p10 = scmp.ne.s32.totalorder %s166_s3, %s97_s8  ;;  %p101_p11 = scmp.lt.u32.totalorder %s97_s8, %s166_s3 }
  0x25   :  { %p103_p12 = pnand %p101_p11, %p98_p10 }
  0x27   :  { %106 = shalt.err (!%p103_p12)
}
  0x28   :  { %62 = dma.vmem_to_hbm [thread:$0]  %s60_s4, 16, %s166_s3, [#allocation4]  }
  0x29   :  { %109 = dma.done.wait [#allocation4], 16  }
  0x2a   :  { %110 = vsyncadd [#allocation4], 4294967280 }
  0x2b   :  { %66 = vsyncpa [#allocation4], 1 }
  0x2c   :  { %67 = vsyncpa [#allocation5], 1 }

</bundles_post_ra>
